<compile_context>
chip_gen: v7x
topology: tpu7x:2x2x1
jax: 0.10.0
libtpu: 0.0.40
codegen_flags: <defaults>
</compile_context>

<pallas_src>
import functools

import jax
import jax.numpy as jnp
from jax.experimental import pallas as pl
from jax.experimental.pallas import tpu as pltpu


# ----------------------------- Pallas kernel -------------------------------


def _attn_block_kernel(g_ref, x_ref, wgT_ref, wxT_ref, b_ref, wp_ref, bp_ref,
                       out_ref, *, small_ncoef, approx_sigmoid):
    # g_ref  : [F_g, T]              gate pixels (channel-major, lane-dense)
    # x_ref  : [F_l, T]              skip-connection pixels
    # wgT_ref: [n_coef, F_g]         W_gate weight (BN folded, transposed)
    # wxT_ref: [n_coef, F_l]         W_x weight    (BN folded, transposed)
    # b_ref  : [n_coef, 1]           combined bias bg + bx (f32)
    # wp_ref : [n_coef, 1] or [1, n_coef]  attn_score weight (f32)
    # bp_ref : [1, 1]                attn_score bias (f32)
    g = g_ref[...]                    # native dtype — MXU takes bf16/f32 directly
    x = x_ref[...]

    pre = (jnp.dot(wgT_ref[...], g, preferred_element_type=jnp.float32)
           + jnp.dot(wxT_ref[...], x, preferred_element_type=jnp.float32)
           + b_ref[...])                                   # [n_coef, T] f32
    a = jnp.maximum(pre, 0.0)                              # ReLU

    if small_ncoef:
        # M=1 projection as VPU broadcast-multiply + sublane reduce (XLU);
        # avoids an MXU push/drain for a single output row.
        s = jnp.sum(a * wp_ref[...], axis=0, keepdims=True) + bp_ref[...]
    else:
        s = jnp.dot(wp_ref[...], a, preferred_element_type=jnp.float32) + bp_ref[...]

    # sigmoid: exp on the EUP; reciprocal approx only on low-precision paths.
    e = jnp.exp(-s)
    if approx_sigmoid:
        score = pl.reciprocal(1.0 + e, approx=True)
    else:
        score = 1.0 / (1.0 + e)                            # [1, T]

    out_ref[...] = (x * score.astype(x.dtype)).astype(out_ref.dtype)


# ------------------------------ JAX wrapper ---------------------------------


def _fold_bn(w, b, gamma, beta, mean, var, eps=1e-5):
    """Fold eval-mode BatchNorm into a 1x1 conv: y = conv(x)*s + t."""
    s = gamma / jnp.sqrt(var + eps)          # [C_out]
    w_f = w * s[None, :]                     # w: [C_in, C_out]
    b_f = (b - mean) * s + beta
    return w_f, b_f


def _round_up(x, m):
    return ((x + m - 1) // m) * m


def _pick_tile_and_vmem(HW, N, F_g, F_l, n_coef, itemsize):
    """Largest 128-aligned pixel tile that fits the generation's VMEM budget,
    capped so there are enough grid steps for the DMA pipeline / megacore."""
    try:
        vmem_cap = int(pltpu.get_tpu_info().vmem_capacity_bytes)
    except Exception:  # pragma: no cover - conservative fallback (v7x-sized)
        vmem_cap = 64 << 20
    budget = max(8 << 20, (vmem_cap * 3) // 4)   # headroom for Mosaic scratch

    # Per-pixel VMEM bytes: double-buffered g/x inputs + double-buffered out,
    # plus in-kernel f32 intermediates pre/a ([n_coef, T]) and the score row.
    per_px = (2 * (F_g + F_l) + 2 * F_l) * itemsize + 2 * n_coef * 4 + 8
    tile_vmem = max(128, ((budget // per_px) // 128) * 128)

    hw_pad = _round_up(HW, 128)

    # Target >= ~8 total grid steps so prologue/epilogue DMAs amortize; when
    # N == 1 force >= 2 pixel tiles so both v7x TensorCores get work.
    tiles_per_batch = max(1, -(-8 // max(N, 1)))
    if N == 1:
        tiles_per_batch = max(tiles_per_batch, 2)
    tile_pipe = max(128, _round_up(-(-HW // tiles_per_batch), 128))

    tile = max(128, min(hw_pad, tile_vmem, tile_pipe))
    return tile, int(budget)


@functools.partial(jax.jit,
                   static_argnames=("tile", "vmem_limit", "small_ncoef"))
def _attention_block_impl(gate, skip, params, *, tile, vmem_limit, small_ncoef):
    N, F_g, H, W = gate.shape
    _, F_l, _, _ = skip.shape
    HW = H * W
    act_dtype = skip.dtype

    wg, bg = _fold_bn(params["wg"], params["bg"], params["bn_g_gamma"],
                      params["bn_g_beta"], params["bn_g_mean"], params["bn_g_var"])
    wx, bx = _fold_bn(params["wx"], params["bx"], params["bn_x_gamma"],
                      params["bn_x_beta"], params["bn_x_mean"], params["bn_x_var"])
    wp, bp = _fold_bn(params["wp"], params["bp"], params["bn_p_gamma"],
                      params["bn_p_beta"], params["bn_p_mean"], params["bn_p_var"])
    n_coef = wg.shape[1]

    # Transpose weights once so the in-kernel dots are [n_coef, C] @ [C, T];
    # cast to the activation dtype (bf16 path stays on the fast MXU path,
    # accumulation is f32 via preferred_element_type).
    wgT = wg.T.astype(act_dtype)                     # [n_coef, F_g]
    wxT = wx.T.astype(act_dtype)                     # [n_coef, F_l]
    b_comb = (bg + bx).reshape(n_coef, 1).astype(jnp.float32)
    bp2 = bp.reshape(1, 1).astype(jnp.float32)
    if small_ncoef:
        wp2 = wp.reshape(n_coef, 1).astype(jnp.float32)      # VPU reduce path
        wp_shape = (n_coef, 1)
    else:
        wp2 = wp.T.reshape(1, n_coef).astype(jnp.float32)    # MXU path
        wp_shape = (1, n_coef)

    # Native NCHW; just merge the spatial dims (free reshape, no transpose).
    g3 = gate.reshape(N, F_g, HW)
    x3 = skip.reshape(N, F_l, HW)

    n_tiles = pl.cdiv(HW, tile)
    grid = (N, n_tiles)

    pix_spec = lambda C: pl.BlockSpec((None, C, tile), lambda n, j: (n, 0, j))
    wspec = lambda shape: pl.BlockSpec(shape, lambda n, j: (0, 0))

    itemsize = jnp.dtype(act_dtype).itemsize
    cost = pl.CostEstimate(
        flops=int(2 * N * HW * n_coef * (F_g + F_l + 1) + 4 * N * HW * n_coef),
        transcendentals=int(N * HW),
        bytes_accessed=int(N * HW * (F_g + 2 * F_l) * itemsize),
    )

    kernel = functools.partial(
        _attn_block_kernel,
        small_ncoef=small_ncoef,
        approx_sigmoid=jnp.dtype(act_dtype) != jnp.dtype(jnp.float32),
    )

    out = pl.pallas_call(
        kernel,
        out_shape=jax.ShapeDtypeStruct((N, F_l, HW), act_dtype),
        grid_spec=pltpu.PrefetchScalarGridSpec(
            num_scalar_prefetch=0,
            grid=grid,
            in_specs=[
                pix_spec(F_g),               # gate pixels
                pix_spec(F_l),               # skip pixels
                wspec((n_coef, F_g)),        # wgT
                wspec((n_coef, F_l)),        # wxT
                wspec((n_coef, 1)),          # combined bias
                wspec(wp_shape),             # attn_score weight
                wspec((1, 1)),               # attn_score bias
            ],
            out_specs=pix_spec(F_l),
        ),
        compiler_params=pltpu.CompilerParams(
            dimension_semantics=("parallel", "parallel"),
            vmem_limit_bytes=int(vmem_limit)),
        cost_estimate=cost,
    )(g3, x3, wgT, wxT, b_comb, wp2, bp2)

    return out.reshape(N, F_l, H, W)


def attention_block(gate, skip, params, compute_dtype=None):
    """gate: [N, F_g, H, W], skip: [N, F_l, H, W]  (NCHW, like PyTorch)."""
    if gate.ndim != 4 or skip.ndim != 4:
        raise ValueError(f"expected 4D NCHW inputs, got {gate.shape}, {skip.shape}")
    if gate.shape[0] != skip.shape[0] or gate.shape[2:] != skip.shape[2:]:
        raise ValueError("gate and skip must share batch and spatial dims, got "
                         f"{gate.shape} vs {skip.shape}")

    N, F_g, H, W = gate.shape
    F_l = skip.shape[1]
    n_coef = params["wg"].shape[1]

    act_dtype = jnp.dtype(compute_dtype) if compute_dtype is not None \
        else jnp.dtype(skip.dtype)
    gate = gate.astype(act_dtype)
    skip = skip.astype(act_dtype)

    tile, vmem_limit = _pick_tile_and_vmem(H * W, N, F_g, F_l, n_coef,
                                           act_dtype.itemsize)
    return _attention_block_impl(gate, skip, params,
                                 tile=tile, vmem_limit=vmem_limit,
                                 small_ncoef=n_coef <= 64)


# ------------------------ deterministic parameters ---------------------------


def make_params(F_g, F_l, n_coef, key):
    ks = jax.random.split(key, 8)
    init = lambda k, shape, scale=0.2: scale * jax.random.normal(k, shape, jnp.float32)
    params = {
        # 1x1 conv weights stored as [C_in, C_out] (matmul form).
        "wg": init(ks[0], (F_g, n_coef)),
        "bg": init(ks[1], (n_coef,)),
        "wx": init(ks[2], (F_l, n_coef)),
        "bx": init(ks[3], (n_coef,)),
        "wp": init(ks[4], (n_coef, 1)),
        "bp": init(ks[5], (1,)),
        # BatchNorm (eval-mode) parameters: affine + running stats.
        "bn_g_gamma": 1.0 + 0.1 * jax.random.normal(ks[6], (n_coef,), jnp.float32),
        "bn_g_beta": jnp.linspace(-0.05, 0.05, n_coef, dtype=jnp.float32),
        "bn_g_mean": 0.01 * jnp.arange(n_coef, dtype=jnp.float32),
        "bn_g_var": jnp.ones((n_coef,), jnp.float32),
        "bn_x_gamma": jnp.ones((n_coef,), jnp.float32),
        "bn_x_beta": jnp.zeros((n_coef,), jnp.float32),
        "bn_x_mean": jnp.zeros((n_coef,), jnp.float32),
        "bn_x_var": jnp.ones((n_coef,), jnp.float32),
        "bn_p_gamma": jnp.ones((1,), jnp.float32),
        "bn_p_beta": jnp.zeros((1,), jnp.float32),
        "bn_p_mean": jnp.zeros((1,), jnp.float32),
        "bn_p_var": jnp.ones((1,), jnp.float32),
        # unused key slot ks[7] kept for determinism of split count
    }
    return params


def attention_block_ref(gate, skip, params):
    """Pure-JAX reference (eval-mode BN) for a sanity check."""
    wg, bg = _fold_bn(params["wg"], params["bg"], params["bn_g_gamma"],
                      params["bn_g_beta"], params["bn_g_mean"], params["bn_g_var"])
    wx, bx = _fold_bn(params["wx"], params["bx"], params["bn_x_gamma"],
                      params["bn_x_beta"], params["bn_x_mean"], params["bn_x_var"])
    wp, bp = _fold_bn(params["wp"], params["bp"], params["bn_p_gamma"],
                      params["bn_p_beta"], params["bn_p_mean"], params["bn_p_var"])
    g = jnp.transpose(gate, (0, 2, 3, 1))
    x = jnp.transpose(skip, (0, 2, 3, 1))
    g1 = jnp.einsum("nhwc,cd->nhwd", g, wg) + bg
    x1 = jnp.einsum("nhwc,cd->nhwd", x, wx) + bx
    a = jnp.maximum(g1 + x1, 0.0)
    s = jax.nn.sigmoid(jnp.einsum("nhwd,do->nhwo", a, wp) + bp)
    out = x * s
    return jnp.transpose(out, (0, 3, 1, 2))


if __name__ == "__main__":
    # Small shapes: batch=2, F_g=F_l=4 channels, 16x16 spatial, n_coefficients=8.
    N, F_g, F_l, H, W, n_coef = 2, 4, 4, 16, 16, 8
    key = jax.random.PRNGKey(0)
    k_g, k_x, k_p = jax.random.split(key, 3)

    gate = jax.random.normal(k_g, (N, F_g, H, W), jnp.float32)
    skip = jax.random.normal(k_x, (N, F_l, H, W), jnp.float32)
    params = make_params(F_g, F_l, n_coef, k_p)

    ref = attention_block_ref(gate, skip, params)

    # f32 path — exact sigmoid, tight tolerance.
    out = attention_block(gate, skip, params)
    out = jax.block_until_ready(out)
    assert out.shape == (N, F_l, H, W)
    assert jnp.max(jnp.abs(out - ref)) < 1e-4

    # bf16 end-to-end path (perf-review item): shape / finiteness / loose check.
    out_bf16 = attention_block(gate, skip, params, compute_dtype=jnp.bfloat16)
    out_bf16 = jax.block_until_ready(out_bf16).astype(jnp.float32)
    assert out_bf16.shape == (N, F_l, H, W)
    assert bool(jnp.all(jnp.isfinite(out_bf16)))
    assert jnp.max(jnp.abs(out_bf16 - ref)) < 0.1

    print("KERNEL_OK")
</pallas_src>

<mosaic_0001>
module attributes {stable_mosaic.version = 11 : i64} {
  func.func @_attn_block_kernel(%arg0: i32, %arg1: i32, %arg2: memref<1x4x128xf32, #tpu.memory_space<vmem>>, %arg3: memref<1x4x128xf32, #tpu.memory_space<vmem>>, %arg4: memref<8x4xf32, #tpu.memory_space<vmem>>, %arg5: memref<8x4xf32, #tpu.memory_space<vmem>>, %arg6: memref<8x1xf32, #tpu.memory_space<vmem>>, %arg7: memref<8x1xf32, #tpu.memory_space<vmem>>, %arg8: memref<1x1xf32, #tpu.memory_space<vmem>>, %arg9: memref<1x4x128xf32, #tpu.memory_space<vmem>>) attributes {dimension_semantics = [#tpu.dimension_semantics<parallel>, #tpu.dimension_semantics<parallel>], iteration_bounds = array<i64: 2, 2>, scalar_prefetch = 0 : i64, scratch_operands = 0 : i64, tpu.core_type = #tpu.core_type<tc>, window_params = [{transform_indices = @transform_0, window_bounds = array<i64: 1, 4, 128>}, {transform_indices = @transform_1, window_bounds = array<i64: 1, 4, 128>}, {pipeline_mode = #tpu.pipeline_mode<synchronous>, transform_indices = @transform_2, window_bounds = array<i64: 8, 4>}, {pipeline_mode = #tpu.pipeline_mode<synchronous>, transform_indices = @transform_3, window_bounds = array<i64: 8, 4>}, {pipeline_mode = #tpu.pipeline_mode<synchronous>, transform_indices = @transform_4, window_bounds = array<i64: 8, 1>}, {pipeline_mode = #tpu.pipeline_mode<synchronous>, transform_indices = @transform_5, window_bounds = array<i64: 8, 1>}, {pipeline_mode = #tpu.pipeline_mode<synchronous>, transform_indices = @transform_6, window_bounds = array<i64: 1, 1>}, {transform_indices = @transform_7, window_bounds = array<i64: 1, 4, 128>}]} {
    %c0 = arith.constant 0 : index
    %c0_0 = arith.constant 0 : index
    %c0_1 = arith.constant 0 : index
    %0 = vector.load %arg2[%c0, %c0_0, %c0_1] : memref<1x4x128xf32, #tpu.memory_space<vmem>>, vector<1x4x128xf32>
    %1 = vector.shape_cast %0 : vector<1x4x128xf32> to vector<4x128xf32>
    %c0_2 = arith.constant 0 : index
    %c0_3 = arith.constant 0 : index
    %c0_4 = arith.constant 0 : index
    %2 = vector.load %arg3[%c0_2, %c0_3, %c0_4] : memref<1x4x128xf32, #tpu.memory_space<vmem>>, vector<1x4x128xf32>
    %3 = vector.shape_cast %2 : vector<1x4x128xf32> to vector<4x128xf32>
    %c0_5 = arith.constant 0 : index
    %c0_6 = arith.constant 0 : index
    %4 = vector.load %arg4[%c0_5, %c0_6] : memref<8x4xf32, #tpu.memory_space<vmem>>, vector<8x4xf32>
    %cst = arith.constant dense<0.000000e+00> : vector<8x128xf32>
    %5 = tpu.matmul %4, %1, %cst {dimension_numbers = #tpu.dot_dimension_numbers<[1], [0], [0], [1], [0, 0, 1, 1], [], []>} : vector<8x4xf32>, vector<4x128xf32>, vector<8x128xf32> -> vector<8x128xf32>
    %c0_7 = arith.constant 0 : index
    %c0_8 = arith.constant 0 : index
    %6 = vector.load %arg5[%c0_7, %c0_8] : memref<8x4xf32, #tpu.memory_space<vmem>>, vector<8x4xf32>
    %cst_9 = arith.constant dense<0.000000e+00> : vector<8x128xf32>
    %7 = tpu.matmul %6, %3, %cst_9 {dimension_numbers = #tpu.dot_dimension_numbers<[1], [0], [0], [1], [0, 0, 1, 1], [], []>} : vector<8x4xf32>, vector<4x128xf32>, vector<8x128xf32> -> vector<8x128xf32>
    %8 = arith.addf %5, %7 : vector<8x128xf32>
    %c0_10 = arith.constant 0 : index
    %c0_11 = arith.constant 0 : index
    %9 = vector.load %arg6[%c0_10, %c0_11] : memref<8x1xf32, #tpu.memory_space<vmem>>, vector<8x1xf32>
    %10 = vector.broadcast %9 : vector<8x1xf32> to vector<8x128xf32>
    %11 = arith.addf %8, %10 : vector<8x128xf32>
    %cst_12 = arith.constant 0.000000e+00 : f32
    %12 = vector.broadcast %cst_12 : f32 to vector<8x128xf32>
    %13 = arith.maximumf %11, %12 : vector<8x128xf32>
    %c0_13 = arith.constant 0 : index
    %c0_14 = arith.constant 0 : index
    %14 = vector.load %arg7[%c0_13, %c0_14] : memref<8x1xf32, #tpu.memory_space<vmem>>, vector<8x1xf32>
    %15 = vector.broadcast %14 : vector<8x1xf32> to vector<8x128xf32>
    %16 = arith.mulf %13, %15 : vector<8x128xf32>
    %cst_15 = arith.constant dense<0.000000e+00> : vector<128xf32>
    %17 = vector.multi_reduction <add>, %16, %cst_15 [0] : vector<8x128xf32> to vector<128xf32>
    %18 = vector.shape_cast %17 : vector<128xf32> to vector<1x128xf32>
    %c0_16 = arith.constant 0 : index
    %c0_17 = arith.constant 0 : index
    %19 = vector.load %arg8[%c0_16, %c0_17] : memref<1x1xf32, #tpu.memory_space<vmem>>, vector<1x1xf32>
    %20 = vector.broadcast %19 : vector<1x1xf32> to vector<1x128xf32>
    %21 = arith.addf %18, %20 : vector<1x128xf32>
    %cst_18 = arith.constant 0.000000e+00 : f32
    %22 = vector.broadcast %cst_18 : f32 to vector<1x128xf32>
    %23 = arith.subf %22, %21 : vector<1x128xf32>
    %24 = math.exp %23 : vector<1x128xf32>
    %cst_19 = arith.constant 1.000000e+00 : f32
    %25 = vector.broadcast %cst_19 : f32 to vector<1x128xf32>
    %26 = arith.addf %25, %24 : vector<1x128xf32>
    %cst_20 = arith.constant 1.000000e+00 : f32
    %27 = vector.broadcast %cst_20 : f32 to vector<1x128xf32>
    %28 = arith.divf %27, %26 : vector<1x128xf32>
    %29 = vector.broadcast %28 : vector<1x128xf32> to vector<4x128xf32>
    %30 = arith.mulf %3, %29 : vector<4x128xf32>
    %c0_21 = arith.constant 0 : index
    %c0_22 = arith.constant 0 : index
    %c0_23 = arith.constant 0 : index
    %31 = vector.load %arg9[%c0_21, %c0_22, %c0_23] : memref<1x4x128xf32, #tpu.memory_space<vmem>>, vector<1x4x128xf32>
    %32 = vector.shape_cast %31 : vector<1x4x128xf32> to vector<4x128xf32>
    %33 = vector.shape_cast %30 : vector<4x128xf32> to vector<1x4x128xf32>
    tpu.vector_store %arg9[%c0_21, %c0_22, %c0_23], %33 {strides = array<i32>} : memref<1x4x128xf32, #tpu.memory_space<vmem>>, vector<1x4x128xf32>,
    return
  }
  func.func @transform_0(%arg0: i32, %arg1: i32) -> (i32, i32, i32) {
    %c0_i32 = arith.constant 0 : i32
    %c0_i32_0 = arith.constant 0 : i32
    return %arg0, %c0_i32, %arg1 : i32, i32, i32
  }
  func.func @transform_1(%arg0: i32, %arg1: i32) -> (i32, i32, i32) {
    %c0_i32 = arith.constant 0 : i32
    %c0_i32_0 = arith.constant 0 : i32
    return %arg0, %c0_i32, %arg1 : i32, i32, i32
  }
  func.func @transform_2(%arg0: i32, %arg1: i32) -> (i32, i32) {
    %c0_i32 = arith.constant 0 : i32
    %c0_i32_0 = arith.constant 0 : i32
    %c0_i32_1 = arith.constant 0 : i32
    return %c0_i32, %c0_i32_0 : i32, i32
  }
  func.func @transform_3(%arg0: i32, %arg1: i32) -> (i32, i32) {
    %c0_i32 = arith.constant 0 : i32
    %c0_i32_0 = arith.constant 0 : i32
    %c0_i32_1 = arith.constant 0 : i32
    return %c0_i32, %c0_i32_0 : i32, i32
  }
  func.func @transform_4(%arg0: i32, %arg1: i32) -> (i32, i32) {
    %c0_i32 = arith.constant 0 : i32
    %c0_i32_0 = arith.constant 0 : i32
    %c0_i32_1 = arith.constant 0 : i32
    return %c0_i32, %c0_i32_0 : i32, i32
  }
  func.func @transform_5(%arg0: i32, %arg1: i32) -> (i32, i32) {
    %c0_i32 = arith.constant 0 : i32
    %c0_i32_0 = arith.constant 0 : i32
    %c0_i32_1 = arith.constant 0 : i32
    return %c0_i32, %c0_i32_0 : i32, i32
  }
  func.func @transform_6(%arg0: i32, %arg1: i32) -> (i32, i32) {
    %c0_i32 = arith.constant 0 : i32
    %c0_i32_0 = arith.constant 0 : i32
    %c0_i32_1 = arith.constant 0 : i32
    return %c0_i32, %c0_i32_0 : i32, i32
  }
  func.func @transform_7(%arg0: i32, %arg1: i32) -> (i32, i32, i32) {
    %c0_i32 = arith.constant 0 : i32
    %c0_i32_0 = arith.constant 0 : i32
    return %arg0, %c0_i32, %arg1 : i32, i32, i32
  }
}

</mosaic_0001>

<bundles_post_ra>
// kernel: _attention_block_impl.1
= control target key start
LH: loop header
LB: loop body
LE: loop exit
PB: predicated region body
PF: predicated region fallthrough
CT: control target
= control target key end

     0   :  { %s811_s26 = smov 0   ;;  %s813_s27 = smov 0   ;;  %s882_s0 = inlined_call_operand.vmem [shape: f32[2,4,256], index: 0, kind: input, shape index: {}]   ;;  %s883_s1 = inlined_call_operand.vmem [shape: f32[2,4,256], index: 1, kind: input, shape index: {}]   ;;  %s884_s2 = inlined_call_operand.vmem [shape: f32[8,4], index: 2, kind: input, shape index: {}]   ;;  %s885_s3 = inlined_call_operand.vmem [shape: f32[8,4], index: 3, kind: input, shape index: {}]   ;;  %s886_s4 = inlined_call_operand.vmem [shape: f32[8,1], index: 4, kind: input, shape index: {}]   ;;  %s887_s5 = inlined_call_operand.vmem [shape: f32[8,1], index: 5, kind: input, shape index: {}]   ;;  %s888_s6 = inlined_call_operand.<no memory space> [shape: f32[1,1], index: 6, kind: input, shape index: {}]   ;;  %s889_s7 = inlined_call_operand.vmem [shape: f32[2,4,256], index: 7, kind: output, shape index: {}]  }
   0x1   :  { %v12_v0 = vstv %s888_s6  ;;  %s815_s28 = smov 0   ;;  %s817_s29 = smov 0  }
   0x2   :  { %13 = vst [vmem:[#allocation2] sm:$0x1] %v12_v0  ;;  %s819_s30 = smov 0  }
   0x3 LB: > { %s28_s6 = sadd.s32 1, %s755_s28  ;;  %s31_s8 = sadd.s32 1, %s759_s29  ;;  %s763_s30 = sphi %s819_s30, %s19_s30   ;;  %s759_s29 = sphi %s817_s29, %s893_s29   ;;  %s755_s28 = sphi %s815_s28, %s892_s28   ;;  %s751_s27 = sphi %s813_s27, %s891_s27   ;;  %s747_s26 = sphi %s811_s26, %s890_s26  }
   0x4   : > { %p29_p0 = scmp.ge.s32.totalorder %s28_s6, 2  ;;  %p649_p1 = scmp.ge.s32.totalorder %s763_s30, 1 }
   0x5   : > { %p273_p2 = scmp.lt.s32.totalorder %s763_s30, 5 }
   0x6   : > { %s895_s6 = smov (%p29_p0, %s28_s6), 0  ;;  %s897_s8 = smov (!%p29_p0, %s31_s8), %s759_s29 }
   0x7   : > { %p274_p3 = pnand %p649_p1, %p273_p2  ;;  %p33_p4 = scmp.ge.s32.totalorder %s897_s8, 2 }
   0x8   : > { %p319_p5 = scmp.lt.s32.totalorder (!%p274_p3), %s751_s27, 1  ;;  %p321_p6 = scmp.lt.s32.totalorder (!%p274_p3), %s747_s26, 1  ;;  %v765_v1 = vmov (!%p274_p3), 0.0   ;;  %v501_v2 = vld [vmem:[%s886_s4] sm:$0xff] (!%p274_p3)  ;;  %vm766_vm0 = vmmov (!%p274_p3), 0   ;;  %v767_v4 = vmov (!%p274_p3), 0   ;;  %v528_v18 = vlaneseq (!%p274_p3) }
   0x9   : > { %s899_s8 = smov (%p33_p4, %s897_s8), 0  ;;  %277 = sbr.rel (%p274_p3) target bundleno = 289 (0x121), region = 48 }
   0xa   : > { %666 = vmatprep.subr.mxu0 (!%p274_p3), %v765_v1  ;;  %671 = vmatprep.subr.mxu1 (!%p274_p3), %v765_v1  ;;  %v522_v3 = vld [vmem:[#allocation2] sm:$0x1] (!%p274_p3)  ;;  %vm351_vm1 = vcmask (!%p274_p3), 1043456   ;;  %vm347_vm2 = vcmask (!%p274_p3), 31744   ;;  %v529_v22 = vshrl.u32 (!%p274_p3), %v528_v18, 7 }
   0xb   : > { %668 = vmatprep.mubr.msk.f32.mxu0 (!%p274_p3), %vm766_vm0, %v765_v1  ;;  %673 = vmatprep.mubr.msk.f32.mxu1 (!%p274_p3), %vm766_vm0, %v765_v1  ;;  %v509_v5 = vld [vmem:[%s887_s5] sm:$0xff] (!%p274_p3) }
   0xc   : > { %719 = vset.pattern.permute.xlu0 (!%p274_p3), %v767_v4  ;;  %720 = vset.pattern.permute.xlu1 (!%p274_p3), %v767_v4  ;;  %v346_v6 = vld [vmem:[%s885_s3] sm:$0xff] (!%p274_p3)  ;;  %v530_v25 = vsub.s32 (!%p274_p3), 0, %v529_v22 }
   0xd   : > { %504 = vperm.xlu0 (!%p274_p3), %719, %v501_v2   ;;  %525 = vperm.xlu1 (!%p274_p3), %720, %v522_v3   ;;  %v345_v8 = vld [vmem:[%s884_s2] sm:$0xff] (!%p274_p3) }
  0x10   : > { %s901_s27 = smov (!%p319_p5, %s751_s27), 1  ;;  %s903_s26 = smov (!%p321_p6, %s747_s26), 1 }
  0x11   : > { %s650_s11 = sshll.u32 %s901_s27, 1  ;;  %512 = vperm.xlu0 %719, %v509_v5  }
  0x12   : > { %s324_s12 = sadd.s32 %s650_s11, %s903_s26 }
  0x13   : > { %s847_s15 = sshll.u32 %s324_s12, 2 }
  0x14   : > { %s334_s18 = scalar_lea.vmem %s883_s1, %s847_s15  ;;  %s326_s23 = scalar_lea.vmem %s882_s0, %s847_s15 }
  0x15   : > { %v344_v7 = vld [vmem:[%s334_s18] sm:$0xf]  ;;  %s342_s9 = scalar_lea.vmem %s889_s7, %s847_s15 }
  0x16   : > { %667 = vmatpush3.msk.msra.mxu0 %vm351_vm1, %v344_v7  ;;  %v343_v9 = vld [vmem:[%s326_s23] sm:$0xf] }
  0x17   : > { %672 = vmatpush3.msk.msra.mxu1 %vm351_vm1, %v343_v9  ;;  %669 = vmatmul.mubr.msk.f32.vlgmr.msra.gmra.mrb[0].mxu0 %vm347_vm2, %v346_v6 }
  0x18   : > { %674 = vmatmul.mubr.msk.f32.vlgmr.msra.gmra.mrb[0].mxu1 %vm347_vm2, %v345_v8 }
  0x8c   : > { %v505_v10 = vpop.permute.xlu0 %504  ;;  %v526_v26 = vpop.permute.xlu1 %525 }
  0x8d   : > { %v531_v29 = vrot.slane %v526_v26, %v530_v25 }
  0x90   : > { %v513_v19 = vpop.permute.xlu0 %512 }
  0xea   : > { %v421_v11 = vpop.f32.mrb[0].mxu0 }
  0xeb   : > { %v497_v12 = vpop.f32.mrb[0].mxu1  ;;  %v670_v13 = vpop.f32.mrb[1].mxu0 }
  0xec   : > { %v498_v14 = vadd.f32 %v497_v12, %v421_v11  ;;  %v675_v15 = vpop.f32.mrb[1].mxu1 }
  0xee   : > { %v507_v16 = vadd.f32 %v505_v10, %v498_v14 }
  0xf0   : > { %v508_v17 = vmax.f32 %v507_v16, 0.0 }
  0xf2   : > { %v515_v20 = vmul.f32 %v513_v19, %v508_v17 }
  0xf4   : > { %v516_v21 = vrot.slane %v515_v20, 4 }
  0xf6   : > { %v517_v23 = vadd.f32 %v516_v21, %v515_v20 }
  0xf8   : > { %v518_v24 = vrot.slane %v517_v23, 2 }
  0xfa   : > { %v519_v27 = vadd.f32 %v518_v24, %v517_v23 }
  0xfc   : > { %v520_v28 = vrot.slane %v519_v27, 1 }
  0xfe   : > { %v521_v30 = vadd.f32 %v520_v28, %v519_v27 }
 0x100   : > { %v532_v31 = vadd.f32 %v531_v29, %v521_v30 }
 0x102   : > { %v533_v32 = vsub.f32 0.0, %v532_v31 }
 0x104   : > { %v534_v33 = vmul.f32 1.442695, %v533_v32 }
 0x106   : > { %721 = vpow2.f32 %v534_v33 }
 0x110   : > { %v722_v34 = vpop.eup %721 }
 0x111   : > { %v536_v35 = vadd.f32 1.0, %v722_v34 }
 0x113   : > { %723 = vrcp.f32 %v536_v35 }
 0x11d   : > { %v724_v36 = vpop.eup %723 }
 0x11e   : > { %v539_v37 = vmul.f32 %v724_v36, %v344_v7 }
 0x120   : > { %540 = vst [vmem:[%s342_s9] sm:$0xf] %v539_v37 }
 0x121 PF: > { %s19_s30 = sadd.s32 1, %s763_s30   ;;  %s890_s26 = smov %s755_s28 }
 0x122   : > { %p16_p7 = scmp.ge.s32.totalorder %s19_s30, 6   ;;  %s891_s27 = smov %s759_s29 }
 0x123   : > { %s892_s28 = smov %s895_s6  ;;  %s893_s29 = smov %s899_s8 }
 0x124   :  { %18 = sbr.rel (!%p16_p7) target bundleno = 3 (0x3), region = 81 }

</bundles_post_ra>
